<compile_context>
chip_gen: v7x
topology: tpu7x:2x2x1
jax: 0.10.0
libtpu: 0.0.40
codegen_flags: <defaults>
</compile_context>

<pallas_src>
import functools

import jax
import jax.numpy as jnp
import numpy as np
from jax.experimental import pallas as pl
from jax.experimental.pallas import tpu as pltpu


_NEG_LARGE = -1e30  # finite stand-in for -inf (avoids inf - inf = nan)


def _round_up(x, m):
    return ((x + m - 1) // m) * m


def _label_smoothing_kernel(smooth_val, confidence, v_total, v_pad,
                            t_tile, v_tile, use_mxu_sum,
                            # scalar prefetch
                            lens_ref, last_ref,
                            # inputs
                            logits_ref, targets_ref,
                            # output (per-(b, t_tile) partials, (8, 128) slab)
                            out_ref,
                            # scratch: per-row online-logsumexp state
                            m_ref, l_ref, wx_ref):
    del last_ref  # only used by the index_maps
    b = pl.program_id(0)
    t = pl.program_id(1)
    v = pl.program_id(2)
    n_v = pl.num_programs(2)

    t_start = t * t_tile
    tile_active = t_start < lens_ref[b]

    # Fully padded (b, t_tile): skip all compute, just emit zero partials.
    @pl.when(jnp.logical_not(tile_active))
    def _():
        @pl.when(v == n_v - 1)
        def _():
            out_ref[...] = jnp.zeros_like(out_ref)

    @pl.when(tile_active)
    def _():
        # (Re)initialize the per-row running state on the first vocab tile.
        @pl.when(v == 0)
        def _():
            m_ref[...] = jnp.full_like(m_ref, _NEG_LARGE)
            l_ref[...] = jnp.zeros_like(l_ref)
            wx_ref[...] = jnp.zeros_like(wx_ref)

        x = logits_ref[...].astype(jnp.float32)              # (tT, tV)

        # --- online logsumexp over vocab tiles ---
        # Padded vocab columns are zeros (jnp.pad); they may pull the running
        # max up to 0 and add exp(-m) each to l, which is removed *exactly*
        # at finalize, so no per-element masking is needed in the hot loop.
        m_prev = m_ref[...]                                   # (tT, 1)
        m_new = jnp.maximum(m_prev, jnp.max(x, axis=-1, keepdims=True))
        p = jnp.exp(x - m_new)
        l_ref[...] = (l_ref[...] * jnp.exp(m_prev - m_new)
                      + jnp.sum(p, axis=-1, keepdims=True))
        m_ref[...] = m_new

        # sum_v x  (zero pad columns contribute nothing). For bf16 inputs the
        # reduction rides the otherwise idle MXU (bit-identical to the VPU
        # sum: bf16 * 1.0 products accumulated in f32).
        if use_mxu_sum:
            ones = jnp.ones((v_tile, 128), dtype=jnp.bfloat16)
            sx = jnp.dot(logits_ref[...], ones,
                         preferred_element_type=jnp.float32)[:, :1]
        else:
            sx = jnp.sum(x, axis=-1, keepdims=True)

        # Raw logit at the target class: compare the *local* lane index with
        # (target - tile offset); avoids a full-tile iota+add per vocab tile.
        lane = jax.lax.broadcasted_iota(jnp.int32, (t_tile, v_tile), 1)
        local_tgt = targets_ref[...] - v * v_tile             # (tT, 1)
        xt = jnp.sum(jnp.where(lane == local_tgt, x, 0.0),
                     axis=-1, keepdims=True)

        # Running weighted-logit sum:  sum_v true_dist_v * x_v
        wx_ref[...] += smooth_val * sx + (confidence - smooth_val) * xt

        # --- finalize on the last vocab tile ---
        @pl.when(v == n_v - 1)
        def _():
            l = l_ref[...]
            if v_pad != v_total:
                # Remove the zero-padded columns' exp(0 - m) contributions.
                l = l - float(v_pad - v_total) * jnp.exp(-m_ref[...])
            lse = m_ref[...] + jnp.log(l)                     # (tT, 1)
            # sum_v true_dist_v == 1  =>  loss = lse - sum_v true_dist_v * x_v
            loss = lse - wx_ref[...]

            row = (jax.lax.broadcasted_iota(jnp.int32, (t_tile, 1), 0)
                   + t_start)
            mask = (row < lens_ref[b]).astype(jnp.float32)

            loss_part = jnp.sum(loss * mask, keepdims=True)   # (1, 1)
            mask_part = jnp.sum(mask, keepdims=True)          # (1, 1)

            rr = jax.lax.broadcasted_iota(jnp.int32, (8, 128), 0)
            cc = jax.lax.broadcasted_iota(jnp.int32, (8, 128), 1)
            out_ref[...] = (jnp.where((rr == 0) & (cc == 0), loss_part, 0.0)
                            + jnp.where((rr == 1) & (cc == 0), mask_part, 0.0))


def label_smoothing_loss(logits, targets, lens, *, smoothing=0.0,
                         reduction='mean'):
    """logits: (B, T, V) f32/bf16, targets: (B, T) int, lens: (B,) int."""
    B, T, V = logits.shape
    smooth_val = float(smoothing) / float(V - 1)
    confidence = 1.0 - float(smoothing)

    # Tile sizes: 256 x 4096 => 4 MiB f32 / 2 MiB bf16 per logits tile.  Big
    # enough to amortize the ~0.35 us/grid-step overhead (>=85% of the HBM
    # roofline), small enough that the double-buffered tile plus the f32
    # temporaries fit v7x's 64 MiB physical VMEM (v5e/v6e have 128 MiB).
    t_tile = min(256, _round_up(T, 8))
    T_pad = _round_up(T, t_tile)
    v_tile = min(4096, _round_up(V, 128))
    V_pad = _round_up(V, v_tile)
    n_t = T_pad // t_tile
    n_v = V_pad // v_tile

    if (T_pad, V_pad) != (T, V):
        logits = jnp.pad(logits, ((0, 0), (0, T_pad - T), (0, V_pad - V)))
    targets_p = targets.astype(jnp.int32)
    if T_pad != T:
        targets_p = jnp.pad(targets_p, ((0, 0), (0, T_pad - T)))
    targets3 = targets_p[..., None]                           # (B, T_pad, 1)
    lens32 = jnp.minimum(lens.astype(jnp.int32), T)           # clip to real T
    # Last active time-tile index per batch element (0 if the sequence is
    # empty) -- used by the index_maps to pin padded tiles to the block the
    # pipeline already holds, so padding issues no fresh DMAs.
    last_act = jnp.maximum(
        (lens32 + (t_tile - 1)) // t_tile - 1, 0).astype(jnp.int32)

    use_mxu_sum = (logits.dtype == jnp.bfloat16)

    kernel = functools.partial(_label_smoothing_kernel,
                               smooth_val, confidence, V, V_pad,
                               t_tile, v_tile, use_mxu_sum)

    def logits_imap(b, t, v, lens_ref, last_ref):
        act = jnp.minimum(jnp.maximum(lens_ref[b] - t * t_tile, 0), 1)
        return (b,
                act * t + (1 - act) * last_ref[b],
                act * v + (1 - act) * (n_v - 1))

    def targets_imap(b, t, v, lens_ref, last_ref):
        act = jnp.minimum(jnp.maximum(lens_ref[b] - t * t_tile, 0), 1)
        return (b, act * t + (1 - act) * last_ref[b], 0)

    partials = pl.pallas_call(
        kernel,
        out_shape=jax.ShapeDtypeStruct((B, n_t, 8, 128), jnp.float32),
        grid_spec=pltpu.PrefetchScalarGridSpec(
            num_scalar_prefetch=2,
            grid=(B, n_t, n_v),
            in_specs=[
                pl.BlockSpec((None, t_tile, v_tile), logits_imap),
                pl.BlockSpec((None, t_tile, 1), targets_imap),
            ],
            out_specs=pl.BlockSpec(
                (None, None, 8, 128),
                lambda b, t, v, lens_ref, last_ref: (b, t, 0, 0)),
            scratch_shapes=[pltpu.VMEM((t_tile, 1), jnp.float32)
                            for _ in range(3)],
        ),
        compiler_params=pltpu.CompilerParams(
            dimension_semantics=("parallel", "parallel", "arbitrary"),
            vmem_limit_bytes=48 * 1024 * 1024),
    )(lens32, last_act, logits, targets3)

    loss_sum = jnp.sum(partials[:, :, 0, 0])
    mask_sum = jnp.sum(partials[:, :, 1, 0])
    if reduction == 'sum':
        return loss_sum
    elif reduction == 'mean':
        # NOTE: NaN if every sequence length is 0 (same as sum()/0 in torch).
        return loss_sum / mask_sum
    else:
        # TODO(synk): reduction='none' (per-token loss tensor) is not emitted
        # by this partial-sum kernel; only 'mean'/'sum' are supported.
        raise NotImplementedError("reduction='none' not supported")


def _reference(logits, targets, lens, smoothing, reduction='mean'):
    B, T, V = logits.shape
    preds = jax.nn.log_softmax(logits.astype(jnp.float32), axis=-1)
    smooth_val = smoothing / (V - 1)
    confidence = 1.0 - smoothing
    onehot = jax.nn.one_hot(targets, V, dtype=preds.dtype)
    true_dist = jnp.where(onehot > 0, confidence, smooth_val)
    loss = jnp.sum(-true_dist * preds, axis=-1)
    mask = (jnp.arange(T)[None, :]
            < jnp.minimum(lens, T)[:, None]).astype(preds.dtype)
    if reduction == 'sum':
        return jnp.sum(loss * mask)
    return jnp.sum(loss * mask) / jnp.sum(mask)


if __name__ == "__main__":
    key = jax.random.PRNGKey(0)
    smoothing = 0.1
    k1, k2, k3, k4, k5, k6 = jax.random.split(key, 6)

    # Case 1: small, aligned shapes (single vocab tile, no padding). Also
    # checks reduction='sum'.
    B, T, V = 2, 8, 128
    logits = jax.random.normal(k1, (B, T, V), dtype=jnp.float32)
    targets = jax.random.randint(k2, (B, T), 0, V, dtype=jnp.int32)
    lens = jnp.array([5, 8], dtype=jnp.int32)

    out = jax.block_until_ready(
        label_smoothing_loss(logits, targets, lens,
                             smoothing=smoothing, reduction='mean'))
    ref = _reference(logits, targets, lens, smoothing, 'mean')
    assert np.allclose(np.asarray(out), np.asarray(ref),
                       rtol=1e-3, atol=1e-3), (out, ref)

    out_s = jax.block_until_ready(
        label_smoothing_loss(logits, targets, lens,
                             smoothing=smoothing, reduction='sum'))
    ref_s = _reference(logits, targets, lens, smoothing, 'sum')
    assert np.allclose(np.asarray(out_s), np.asarray(ref_s),
                       rtol=1e-3, atol=1e-3), (out_s, ref_s)

    # Case 2: unaligned T/V with V > v_tile — exercises time padding, the
    # zero-pad lse correction, the online logsumexp across 2 vocab tiles,
    # an all-padding sequence, and the pinned (no-DMA) padded-tile path.
    B2, T2, V2 = 2, 12, 5000
    logits2 = jax.random.normal(k3, (B2, T2, V2), dtype=jnp.float32)
    targets2 = jax.random.randint(k4, (B2, T2), 0, V2, dtype=jnp.int32)
    lens2 = jnp.array([9, 0], dtype=jnp.int32)

    out2 = jax.block_until_ready(
        label_smoothing_loss(logits2, targets2, lens2,
                             smoothing=smoothing, reduction='mean'))
    ref2 = _reference(logits2, targets2, lens2, smoothing, 'mean')
    assert np.allclose(np.asarray(out2), np.asarray(ref2),
                       rtol=1e-3, atol=1e-3), (out2, ref2)

    # Case 3: bf16 logits — exercises the MXU sum-of-logits path and the
    # vocab-pad correction with a single vocab tile.
    B3, T3, V3 = 2, 10, 300
    logits3 = jax.random.normal(k5, (B3, T3, V3)).astype(jnp.bfloat16)
    targets3 = jax.random.randint(k6, (B3, T3), 0, V3, dtype=jnp.int32)
    lens3 = jnp.array([10, 4], dtype=jnp.int32)

    out3 = jax.block_until_ready(
        label_smoothing_loss(logits3, targets3, lens3,
                             smoothing=smoothing, reduction='mean'))
    ref3 = _reference(logits3, targets3, lens3, smoothing, 'mean')
    assert np.allclose(np.asarray(out3), np.asarray(ref3),
                       rtol=1e-2, atol=1e-2), (out3, ref3)

    print("KERNEL_OK")
</pallas_src>

<mosaic_0001>
module attributes {stable_mosaic.version = 11 : i64} {
  func.func @_label_smoothing_kernel(%arg0: i32, %arg1: i32, %arg2: i32, %arg3: memref<2xi32, #tpu.memory_space<smem>>, %arg4: memref<2xi32, #tpu.memory_space<smem>>, %arg5: memref<1x8x128xf32, #tpu.memory_space<vmem>>, %arg6: memref<1x8x1xi32, #tpu.memory_space<vmem>>, %arg7: memref<1x1x8x128xf32, #tpu.memory_space<vmem>>, %arg8: memref<8x1xf32, #tpu.memory_space<vmem>>, %arg9: memref<8x1xf32, #tpu.memory_space<vmem>>, %arg10: memref<8x1xf32, #tpu.memory_space<vmem>>) attributes {dimension_semantics = [#tpu.dimension_semantics<parallel>, #tpu.dimension_semantics<parallel>, #tpu.dimension_semantics<arbitrary>], iteration_bounds = array<i64: 2, 1, 1>, scalar_prefetch = 2 : i64, scratch_operands = 3 : i64, tpu.core_type = #tpu.core_type<tc>, window_params = [{transform_indices = @transform_0, window_bounds = array<i64: 1, 8, 128>}, {transform_indices = @transform_1, window_bounds = array<i64: 1, 8, 1>}, {transform_indices = @transform_2, window_bounds = array<i64: 1, 1, 8, 128>}]} {
    %c8_i32 = arith.constant 8 : i32
    %0 = arith.muli %arg1, %c8_i32 : i32
    %1 = arith.index_cast %arg0 : i32 to index
    %2 = memref.load %arg3[%1] : memref<2xi32, #tpu.memory_space<smem>>
    %3 = arith.cmpi slt, %0, %2 : i32
    %true = arith.constant true
    %4 = arith.xori %3, %true : i1
    %5 = arith.extui %4 : i1 to i32
    %c0_i32 = arith.constant 0 : i32
    %6 = arith.cmpi ne, %5, %c0_i32 : i32
    scf.if %6 {
      %c0_i32_1 = arith.constant 0 : i32
      %9 = arith.cmpi eq, %arg2, %c0_i32_1 : i32
      %10 = arith.extui %9 : i1 to i32
      %c0_i32_2 = arith.constant 0 : i32
      %11 = arith.cmpi ne, %10, %c0_i32_2 : i32
      scf.if %11 {
        %cst = arith.constant 0.000000e+00 : f32
        %12 = vector.broadcast %cst : f32 to vector<8x128xf32>
        %c0 = arith.constant 0 : index
        %c0_3 = arith.constant 0 : index
        %c0_4 = arith.constant 0 : index
        %c0_5 = arith.constant 0 : index
        %13 = vector.load %arg7[%c0, %c0_3, %c0_4, %c0_5] : memref<1x1x8x128xf32, #tpu.memory_space<vmem>>, vector<1x1x8x128xf32>
        %14 = vector.shape_cast %13 : vector<1x1x8x128xf32> to vector<8x128xf32>
        %15 = vector.shape_cast %12 : vector<8x128xf32> to vector<1x1x8x128xf32>
        tpu.vector_store %arg7[%c0, %c0_3, %c0_4, %c0_5], %15 {strides = array<i32>} : memref<1x1x8x128xf32, #tpu.memory_space<vmem>>, vector<1x1x8x128xf32>,
      } else {
      }
    } else {
    }
    %7 = arith.extui %3 : i1 to i32
    %c0_i32_0 = arith.constant 0 : i32
    %8 = arith.cmpi ne, %7, %c0_i32_0 : i32
    scf.if %8 {
      %c0_i32_1 = arith.constant 0 : i32
      %9 = arith.cmpi eq, %arg2, %c0_i32_1 : i32
      %10 = arith.extui %9 : i1 to i32
      %c0_i32_2 = arith.constant 0 : i32
      %11 = arith.cmpi ne, %10, %c0_i32_2 : i32
      scf.if %11 {
        %cst_28 = arith.constant -1.000000e+30 : f32
        %55 = vector.broadcast %cst_28 : f32 to vector<8x1xf32>
        %c0_29 = arith.constant 0 : index
        %c0_30 = arith.constant 0 : index
        %56 = vector.load %arg8[%c0_29, %c0_30] : memref<8x1xf32, #tpu.memory_space<vmem>>, vector<8x1xf32>
        tpu.vector_store %arg8[%c0_29, %c0_30], %55 {strides = array<i32>} : memref<8x1xf32, #tpu.memory_space<vmem>>, vector<8x1xf32>,
        %cst_31 = arith.constant 0.000000e+00 : f32
        %57 = vector.broadcast %cst_31 : f32 to vector<8x1xf32>
        %c0_32 = arith.constant 0 : index
        %c0_33 = arith.constant 0 : index
        %58 = vector.load %arg9[%c0_32, %c0_33] : memref<8x1xf32, #tpu.memory_space<vmem>>, vector<8x1xf32>
        tpu.vector_store %arg9[%c0_32, %c0_33], %57 {strides = array<i32>} : memref<8x1xf32, #tpu.memory_space<vmem>>, vector<8x1xf32>,
        %cst_34 = arith.constant 0.000000e+00 : f32
        %59 = vector.broadcast %cst_34 : f32 to vector<8x1xf32>
        %c0_35 = arith.constant 0 : index
        %c0_36 = arith.constant 0 : index
        %60 = vector.load %arg10[%c0_35, %c0_36] : memref<8x1xf32, #tpu.memory_space<vmem>>, vector<8x1xf32>
        tpu.vector_store %arg10[%c0_35, %c0_36], %59 {strides = array<i32>} : memref<8x1xf32, #tpu.memory_space<vmem>>, vector<8x1xf32>,
      } else {
      }
      %c0 = arith.constant 0 : index
      %c0_3 = arith.constant 0 : index
      %c0_4 = arith.constant 0 : index
      %12 = vector.load %arg5[%c0, %c0_3, %c0_4] : memref<1x8x128xf32, #tpu.memory_space<vmem>>, vector<1x8x128xf32>
      %13 = vector.shape_cast %12 : vector<1x8x128xf32> to vector<8x128xf32>
      %c0_5 = arith.constant 0 : index
      %c0_6 = arith.constant 0 : index
      %14 = vector.load %arg8[%c0_5, %c0_6] : memref<8x1xf32, #tpu.memory_space<vmem>>, vector<8x1xf32>
      %cst = arith.constant dense<0xFF800000> : vector<8xf32>
      %15 = vector.multi_reduction <maximumf>, %13, %cst [1] : vector<8x128xf32> to vector<8xf32>
      %16 = vector.shape_cast %15 : vector<8xf32> to vector<8x1xf32>
      %17 = arith.maximumf %14, %16 : vector<8x1xf32>
      %18 = vector.broadcast %17 : vector<8x1xf32> to vector<8x128xf32>
      %19 = arith.subf %13, %18 : vector<8x128xf32>
      %20 = math.exp %19 : vector<8x128xf32>
      %c0_7 = arith.constant 0 : index
      %c0_8 = arith.constant 0 : index
      %21 = vector.load %arg9[%c0_7, %c0_8] : memref<8x1xf32, #tpu.memory_space<vmem>>, vector<8x1xf32>
      %22 = arith.subf %14, %17 : vector<8x1xf32>
      %23 = math.exp %22 : vector<8x1xf32>
      %24 = arith.mulf %21, %23 : vector<8x1xf32>
      %cst_9 = arith.constant dense<0.000000e+00> : vector<8xf32>
      %25 = vector.multi_reduction <add>, %20, %cst_9 [1] : vector<8x128xf32> to vector<8xf32>
      %26 = vector.shape_cast %25 : vector<8xf32> to vector<8x1xf32>
      %27 = arith.addf %24, %26 : vector<8x1xf32>
      %c0_10 = arith.constant 0 : index
      %c0_11 = arith.constant 0 : index
      %28 = vector.load %arg9[%c0_10, %c0_11] : memref<8x1xf32, #tpu.memory_space<vmem>>, vector<8x1xf32>
      tpu.vector_store %arg9[%c0_10, %c0_11], %27 {strides = array<i32>} : memref<8x1xf32, #tpu.memory_space<vmem>>, vector<8x1xf32>,
      %c0_12 = arith.constant 0 : index
      %c0_13 = arith.constant 0 : index
      %29 = vector.load %arg8[%c0_12, %c0_13] : memref<8x1xf32, #tpu.memory_space<vmem>>, vector<8x1xf32>
      tpu.vector_store %arg8[%c0_12, %c0_13], %17 {strides = array<i32>} : memref<8x1xf32, #tpu.memory_space<vmem>>, vector<8x1xf32>,
      %cst_14 = arith.constant dense<0.000000e+00> : vector<8xf32>
      %30 = vector.multi_reduction <add>, %13, %cst_14 [1] : vector<8x128xf32> to vector<8xf32>
      %31 = vector.shape_cast %30 : vector<8xf32> to vector<8x1xf32>
      %32 = tpu.iota {dimensions = array<i32: 1>} : vector<8x128xi32>
      %c0_15 = arith.constant 0 : index
      %c0_16 = arith.constant 0 : index
      %c0_17 = arith.constant 0 : index
      %33 = vector.load %arg6[%c0_15, %c0_16, %c0_17] : memref<1x8x1xi32, #tpu.memory_space<vmem>>, vector<1x8x1xi32>
      %34 = vector.shape_cast %33 : vector<1x8x1xi32> to vector<8x1xi32>
      %c128_i32 = arith.constant 128 : i32
      %35 = arith.muli %arg2, %c128_i32 : i32
      %36 = vector.broadcast %35 : i32 to vector<8x1xi32>
      %37 = arith.subi %34, %36 : vector<8x1xi32>
      %38 = vector.broadcast %37 : vector<8x1xi32> to vector<8x128xi32>
      %39 = arith.cmpi eq, %32, %38 : vector<8x128xi32>
      %cst_18 = arith.constant 0.000000e+00 : f32
      %40 = vector.broadcast %cst_18 : f32 to vector<8x128xf32>
      %41 = arith.select %39, %13, %40 : vector<8x128xi1>, vector<8x128xf32>
      %cst_19 = arith.constant dense<0.000000e+00> : vector<8xf32>
      %42 = vector.multi_reduction <add>, %41, %cst_19 [1] : vector<8x128xf32> to vector<8xf32>
      %43 = vector.shape_cast %42 : vector<8xf32> to vector<8x1xf32>
      %c0_20 = arith.constant 0 : index
      %c0_21 = arith.constant 0 : index
      %44 = vector.load %arg10[%c0_20, %c0_21] : memref<8x1xf32, #tpu.memory_space<vmem>>, vector<8x1xf32>
      %cst_22 = arith.constant 7.87401571E-4 : f32
      %45 = vector.broadcast %cst_22 : f32 to vector<8x1xf32>
      %46 = arith.mulf %45, %31 : vector<8x1xf32>
      %cst_23 = arith.constant 0.899212599 : f32
      %47 = vector.broadcast %cst_23 : f32 to vector<8x1xf32>
      %48 = arith.mulf %47, %43 : vector<8x1xf32>
      %49 = arith.addf %46, %48 : vector<8x1xf32>
      %50 = arith.addf %44, %49 : vector<8x1xf32>
      %c0_24 = arith.constant 0 : index
      %c0_25 = arith.constant 0 : index
      %51 = vector.load %arg10[%c0_24, %c0_25] : memref<8x1xf32, #tpu.memory_space<vmem>>, vector<8x1xf32>
      tpu.vector_store %arg10[%c0_24, %c0_25], %50 {strides = array<i32>} : memref<8x1xf32, #tpu.memory_space<vmem>>, vector<8x1xf32>,
      %c0_i32_26 = arith.constant 0 : i32
      %52 = arith.cmpi eq, %arg2, %c0_i32_26 : i32
      %53 = arith.extui %52 : i1 to i32
      %c0_i32_27 = arith.constant 0 : i32
      %54 = arith.cmpi ne, %53, %c0_i32_27 : i32
      scf.if %54 {
        %c0_28 = arith.constant 0 : index
        %c0_29 = arith.constant 0 : index
        %55 = vector.load %arg9[%c0_28, %c0_29] : memref<8x1xf32, #tpu.memory_space<vmem>>, vector<8x1xf32>
        %c0_30 = arith.constant 0 : index
        %c0_31 = arith.constant 0 : index
        %56 = vector.load %arg8[%c0_30, %c0_31] : memref<8x1xf32, #tpu.memory_space<vmem>>, vector<8x1xf32>
        %57 = math.log %55 : vector<8x1xf32>
        %58 = arith.addf %56, %57 : vector<8x1xf32>
        %c0_32 = arith.constant 0 : index
        %c0_33 = arith.constant 0 : index
        %59 = vector.load %arg10[%c0_32, %c0_33] : memref<8x1xf32, #tpu.memory_space<vmem>>, vector<8x1xf32>
        %60 = arith.subf %58, %59 : vector<8x1xf32>
        %61 = tpu.iota {dimensions = array<i32: 0>} : vector<8x1xi32>
        %62 = vector.broadcast %0 : i32 to vector<8x1xi32>
        %63 = arith.addi %61, %62 : vector<8x1xi32>
        %64 = arith.index_cast %arg0 : i32 to index
        %65 = memref.load %arg3[%64] : memref<2xi32, #tpu.memory_space<smem>>
        %66 = vector.broadcast %65 : i32 to vector<8x1xi32>
        %67 = arith.cmpi slt, %63, %66 : vector<8x1xi32>
        %68 = arith.extui %67 : vector<8x1xi1> to vector<8x1xi32>
        %69 = arith.sitofp %68 : vector<8x1xi32> to vector<8x1xf32>
        %70 = arith.mulf %60, %69 : vector<8x1xf32>
        %71 = vector.shape_cast %70 : vector<8x1xf32> to vector<1x8x1xf32>
        %cst_34 = arith.constant dense<0.000000e+00> : vector<1xf32>
        %72 = vector.multi_reduction <add>, %71, %cst_34 [1, 2] : vector<1x8x1xf32> to vector<1xf32>
        %73 = vector.shape_cast %72 : vector<1xf32> to vector<1x1x1xf32>
        %74 = vector.extract %73[0, 0, 0] : f32 from vector<1x1x1xf32>
        %75 = vector.broadcast %74 : f32 to vector<1x1xf32>
        %76 = vector.shape_cast %69 : vector<8x1xf32> to vector<1x8x1xf32>
        %cst_35 = arith.constant dense<0.000000e+00> : vector<1xf32>
        %77 = vector.multi_reduction <add>, %76, %cst_35 [1, 2] : vector<1x8x1xf32> to vector<1xf32>
        %78 = vector.shape_cast %77 : vector<1xf32> to vector<1x1x1xf32>
        %79 = vector.extract %78[0, 0, 0] : f32 from vector<1x1x1xf32>
        %80 = vector.broadcast %79 : f32 to vector<1x1xf32>
        %81 = tpu.iota {dimensions = array<i32: 0>} : vector<8x128xi32>
        %82 = tpu.iota {dimensions = array<i32: 1>} : vector<8x128xi32>
        %c0_i32_36 = arith.constant 0 : i32
        %83 = vector.broadcast %c0_i32_36 : i32 to vector<8x128xi32>
        %84 = arith.cmpi eq, %81, %83 : vector<8x128xi32>
        %c0_i32_37 = arith.constant 0 : i32
        %85 = vector.broadcast %c0_i32_37 : i32 to vector<8x128xi32>
        %86 = arith.cmpi eq, %82, %85 : vector<8x128xi32>
        %87 = arith.andi %84, %86 : vector<8x128xi1>
        %cst_38 = arith.constant 0.000000e+00 : f32
        %88 = vector.shape_cast %75 : vector<1x1xf32> to vector<1x1xf32>
        %89 = vector.broadcast %88 : vector<1x1xf32> to vector<8x128xf32>
        %90 = vector.broadcast %cst_38 : f32 to vector<8x128xf32>
        %91 = arith.select %87, %89, %90 : vector<8x128xi1>, vector<8x128xf32>
        %c1_i32 = arith.constant 1 : i32
        %92 = vector.broadcast %c1_i32 : i32 to vector<8x128xi32>
        %93 = arith.cmpi eq, %81, %92 : vector<8x128xi32>
        %c0_i32_39 = arith.constant 0 : i32
        %94 = vector.broadcast %c0_i32_39 : i32 to vector<8x128xi32>
        %95 = arith.cmpi eq, %82, %94 : vector<8x128xi32>
        %96 = arith.andi %93, %95 : vector<8x128xi1>
        %cst_40 = arith.constant 0.000000e+00 : f32
        %97 = vector.shape_cast %80 : vector<1x1xf32> to vector<1x1xf32>
        %98 = vector.broadcast %97 : vector<1x1xf32> to vector<8x128xf32>
        %99 = vector.broadcast %cst_40 : f32 to vector<8x128xf32>
        %100 = arith.select %96, %98, %99 : vector<8x128xi1>, vector<8x128xf32>
        %101 = arith.addf %91, %100 : vector<8x128xf32>
        %c0_41 = arith.constant 0 : index
        %c0_42 = arith.constant 0 : index
        %c0_43 = arith.constant 0 : index
        %c0_44 = arith.constant 0 : index
        %102 = vector.load %arg7[%c0_41, %c0_42, %c0_43, %c0_44] : memref<1x1x8x128xf32, #tpu.memory_space<vmem>>, vector<1x1x8x128xf32>
        %103 = vector.shape_cast %102 : vector<1x1x8x128xf32> to vector<8x128xf32>
        %104 = vector.shape_cast %101 : vector<8x128xf32> to vector<1x1x8x128xf32>
        tpu.vector_store %arg7[%c0_41, %c0_42, %c0_43, %c0_44], %104 {strides = array<i32>} : memref<1x1x8x128xf32, #tpu.memory_space<vmem>>, vector<1x1x8x128xf32>,
      } else {
      }
    } else {
    }
    return
  }
  func.func @transform_0(%arg0: i32, %arg1: i32, %arg2: i32, %arg3: memref<2xi32, #tpu.memory_space<smem>>, %arg4: memref<2xi32, #tpu.memory_space<smem>>) -> (i32, i32, i32) {
    %0 = arith.index_cast %arg0 : i32 to index
    %1 = memref.load %arg3[%0] : memref<2xi32, #tpu.memory_space<smem>>
    %c8_i32 = arith.constant 8 : i32
    %2 = arith.muli %arg1, %c8_i32 : i32
    %3 = arith.subi %1, %2 : i32
    %c0_i32 = arith.constant 0 : i32
    %4 = arith.maxsi %3, %c0_i32 : i32
    %c1_i32 = arith.constant 1 : i32
    %5 = arith.minsi %4, %c1_i32 : i32
    %6 = arith.muli %5, %arg1 : i32
    %c1_i32_0 = arith.constant 1 : i32
    %7 = arith.subi %c1_i32_0, %5 : i32
    %8 = arith.index_cast %arg0 : i32 to index
    %9 = memref.load %arg4[%8] : memref<2xi32, #tpu.memory_space<smem>>
    %10 = arith.muli %7, %9 : i32
    %11 = arith.addi %6, %10 : i32
    %12 = arith.muli %5, %arg2 : i32
    %c1_i32_1 = arith.constant 1 : i32
    %13 = arith.subi %c1_i32_1, %5 : i32
    %c0_i32_2 = arith.constant 0 : i32
    %14 = arith.muli %13, %c0_i32_2 : i32
    %15 = arith.addi %12, %14 : i32
    %c0_i32_3 = arith.constant 0 : i32
    return %arg0, %11, %15 : i32, i32, i32
  }
  func.func @transform_1(%arg0: i32, %arg1: i32, %arg2: i32, %arg3: memref<2xi32, #tpu.memory_space<smem>>, %arg4: memref<2xi32, #tpu.memory_space<smem>>) -> (i32, i32, i32) {
    %0 = arith.index_cast %arg0 : i32 to index
    %1 = memref.load %arg3[%0] : memref<2xi32, #tpu.memory_space<smem>>
    %c8_i32 = arith.constant 8 : i32
    %2 = arith.muli %arg1, %c8_i32 : i32
    %3 = arith.subi %1, %2 : i32
    %c0_i32 = arith.constant 0 : i32
    %4 = arith.maxsi %3, %c0_i32 : i32
    %c1_i32 = arith.constant 1 : i32
    %5 = arith.minsi %4, %c1_i32 : i32
    %6 = arith.muli %5, %arg1 : i32
    %c1_i32_0 = arith.constant 1 : i32
    %7 = arith.subi %c1_i32_0, %5 : i32
    %8 = arith.index_cast %arg0 : i32 to index
    %9 = memref.load %arg4[%8] : memref<2xi32, #tpu.memory_space<smem>>
    %10 = arith.muli %7, %9 : i32
    %11 = arith.addi %6, %10 : i32
    %c0_i32_1 = arith.constant 0 : i32
    %c0_i32_2 = arith.constant 0 : i32
    return %arg0, %11, %c0_i32_1 : i32, i32, i32
  }
  func.func @transform_2(%arg0: i32, %arg1: i32, %arg2: i32, %arg3: memref<2xi32, #tpu.memory_space<smem>>, %arg4: memref<2xi32, #tpu.memory_space<smem>>) -> (i32, i32, i32, i32) {
    %c0_i32 = arith.constant 0 : i32
    %c0_i32_0 = arith.constant 0 : i32
    %c0_i32_1 = arith.constant 0 : i32
    return %arg0, %arg1, %c0_i32, %c0_i32_0 : i32, i32, i32, i32
  }
}

</mosaic_0001>

<bundles_post_ra>
// kernel: tpu_custom_call.1
= control target key start
LH: loop header
LB: loop body
LE: loop exit
PB: predicated region body
PF: predicated region fallthrough
CT: control target
= control target key end

     0   :  { %s1042_s0 = inlined_call_operand.vmem [shape: s32[2], index: 0, kind: input, shape index: {}]   ;;  %s1043_s2 = inlined_call_operand.vmem [shape: f32[2,8,128], index: 2, kind: input, shape index: {}]   ;;  %s1044_s3 = inlined_call_operand.vmem [shape: s32[2,8,1], index: 3, kind: input, shape index: {}]   ;;  %s1045_s4 = inlined_call_operand.hbm [shape: f32[2,1,8,128], index: 4, kind: output, shape index: {}]   ;;  %s1046_s1 = inlined_call_operand.vmem [shape: s32[2], index: 1, kind: input, shape index: {}]  }
   0x1   :  { %s9_s17 = sshll.u32 %s1042_s0, 4  ;;  %s13_s20 = sshll.u32 %s1046_s1, 4  ;;  %s10_s17 = int_to_ptr.vmem [resolvable:$true] %s9_s17  ;;  %s14_s20 = int_to_ptr.vmem [resolvable:$true] %s13_s20 }
   0x2   :  { %s755_s21 = scalar_lea.vmem %s10_s17, 16  ;;  %p760_p1 = scmp.lt.s32.totalorder %s10_s17, %s10_s17 }
   0x3   :  { %p756_p0 = scmp.ne.s32.totalorder %s10_s17, %s755_s21  ;;  %p761_p2 = scmp.lt.s32.totalorder %s755_s21, %s755_s21 }
   0x5   :  { %p762_p3 = por %p761_p2, %p760_p1 }
   0x7   :  { %p763_p4 = pnand %p762_p3, %p756_p0 }
   0x9   :  { %766 = shalt.err (!%p763_p4)  }
   0xa   :  { %s861_s22 = smov [#allocation6]   ;;  %s767_s23 = scalar_lea.vmem %s14_s20, 16 }
   0xb   :  { %12 = dma.vmem_to_smem %s10_s17, 16, %s861_s22, [#allocation5] }
   0xc   :  { %p768_p5 = scmp.ne.s32.totalorder %s14_s20, %s767_s23  ;;  %p772_p6 = scmp.lt.s32.totalorder %s14_s20, %s14_s20 }
   0xd   :  { %p773_p7 = scmp.lt.s32.totalorder %s767_s23, %s767_s23 }
   0xf   :  { %p774_p8 = por %p773_p7, %p772_p6 }
  0x11   :  { %p775_p9 = pnand %p774_p8, %p768_p5 }
  0x13   :  { %778 = shalt.err (!%p775_p9)  }
  0x14   :  { %s862_s0 = smov [#allocation7]  }
  0x15   :  { %16 = dma.vmem_to_smem %s14_s20, 16, %s862_s0, [#allocation5] }
  0x16   :  { %831 = dma.done.wait [#allocation5], 32 }
  0x17   :  { %832 = vsyncadd [#allocation5], 4294967264 }
  0x18   :  { %18 = sfence }
  0x19   :  { %19 = vsyncpa [#allocation9], 0 }
  0x1a   :  { %21 = vsyncpa [#allocation9 + $0x1], 0  ;;  %s899_s1 = smov 0   ;;  %s901_s24 = smov 0  }
  0x1b   :  { %s903_s25 = smov 0   ;;  %s905_s26 = smov 0  }
  0x1c   :  { %s907_s27 = smov 0   ;;  %s909_s28 = smov 0  }
  0x1d LB: > { %1050 = sst [smem:[#allocation12_spill]] %s855_s27  ;;  %s623_s29 = sadd.s32 4294967295, %s859_s28   ;;  %s859_s28 = sphi %s909_s28, %s27_s28   ;;  %s855_s27 = sphi %s907_s27, %s1056_s27   ;;  %s851_s26 = sphi %s905_s26, %s1055_s26   ;;  %s847_s25 = sphi %s903_s25, %s1059_s25   ;;  %s843_s24 = sphi %s901_s24, %s1058_s24   ;;  %s839_s1 = sphi %s899_s1, %s1057_s1  }
  0x1e   : > { %s624_s30 = sadd.s32 4294967294, %s859_s28   ;;  %s46_s5 = sadd.s32 1, %s855_s27 }
  0x1f   : > { %s163_s6 = sadd.s32 1, %s847_s25  ;;  %p48_p10 = scmp.ge.s32.totalorder %s46_s5, 2 }
  0x20   : > { %p173_p11 = scmp.ne.s32.totalorder %s847_s25, %s843_s24  ;;  %p174_p12 = scmp.eq.s32.totalorder %s623_s29, 1 }
  0x21   : > { %p179_p13 = scmp.ne.s32.totalorder %s843_s24, %s839_s1  ;;  %s1061_s5 = smov (%p48_p10, %s46_s5), 0 }
  0x22   : > { %1051 = sst [smem:[#allocation13_spill]] %s1061_s5  ;;  %p939_p0 = por %p174_p12, %p173_p11 }
  0x23   : > { %p180_p1 = scmp.eq.s32.totalorder %s624_s30, 1  ;;  %s158_s8 = ssub.s32 %s855_s27, %s1061_s5 }
  0x24   : > { %p647_p2 = scmp.ge.s32.totalorder %s859_s28, 1  ;;  %p161_p3 = scmp.eq.s32.totalorder %s158_s8, 0 }
  0x25   : > { %p946_p4 = por %p180_p1, %p179_p13  ;;  %p271_p5 = scmp.lt.s32.totalorder %s859_s28, 3 }
  0x26   : > { %s952_s10 = scalar_select %p161_p3, %s847_s25, %s163_s6  }
  0x27   : > { %p272_p6 = pnand %p647_p2, %p271_p5 }
  0x28   : > { %s1047_s11 = sand.u32 (!%p272_p6), 1, %s843_s24   ;;  %s330_s12 = sld [smem:[#allocation6 + %s851_s26]] (!%p272_p6) }
  0x29   : > { %275 = sbr.rel (%p272_p6) target bundleno = 760 (0x2f8), region = 28  ;;  %s958_s13 = sshll.u32 (!%p272_p6), %s1047_s11, 3 }
  0x2a   : > { %p343_p7 = scmp.lt.s32.totalorder (!%p272_p6), %s851_s26, 1  ;;  %s366_s14 = sld [smem:[#allocation6 + %s851_s26]] (!%p272_p6) }
  0x2b   : > { %s339_s15 = sld [smem:[#allocation7 + %s851_s26]] (!%p272_p6) }
  0x2c   : > { %s375_s16 = sld [smem:[#allocation7 + %s851_s26]] (!%p272_p6) }
  0x2d   : > { %s965_s17 = sld [smem:[#allocation6 + %s851_s26]] (!%p272_p6) }
  0x2e   : > { %p333_p8 = scmp.gt.s32.totalorder (!%p272_p6), %s330_s12, 0  ;;  %p649_p9 = scmp.lt.s32.totalorder (!%p272_p6), %s330_s12, 1 }
  0x30   : > { %s344_s18 = scalar_select %p343_p7, %s851_s26, 1 }
  0x31   : > { %s1063_s12 = smov (!%p333_p8, %s330_s12), 0  ;;  %p369_p10 = scmp.gt.s32.totalorder %s366_s14, 0 }
  0x32   : > { %p655_p11 = scmp.lt.s32.totalorder %s366_s14, 1  ;;  %s1065_s12 = smov (!%p649_p9, %s1063_s12), 1 }
  0x33   : > { %s1067_s14 = smov (!%p369_p10, %s366_s14), 0  ;;  %s338_s19 = ssub.s32 1, %s1065_s12 }
  0x34   : > { %s340_s20 = smul.u32 %s339_s15, %s338_s19  ;;  %s1069_s14 = smov (!%p655_p11, %s1067_s14), 1 }
  0x35   : > { %s374_s21 = ssub.s32 1, %s1069_s14  ;;  %s975_s15 = scalar_lea.vmem [#allocation8], %s958_s13 }
  0x36   : > { %p345_p12 = scmp.lt.s32.totalorder %s340_s20, 0  ;;  %s376_s22 = smul.u32 %s375_s16, %s374_s21 }
  0x37   : > { %p663_p1 = scmp.gt.s32.totalorder %s965_s17, 0 }
  0x38   : > { %s1071_s20 = smov (!%p345_p12, %s340_s20), 0  ;;  %p380_p13 = scmp.lt.s32.totalorder %s376_s22, 0  ;;  %v863_v0 = vmov (!%p663_p1), 0.0  }
  0x39   : > { %s350_s23 = sadd.s32 %s1071_s20, %s344_s18  ;;  %403 = sbr.rel (%p663_p1) target bundleno = 64 (0x40), region = 32  ;;  %408 = vst [vmem:[%s975_s15] sm:$0xff] (!%p663_p1), %v863_v0 }
  0x3a   : > { %s654_s0 = sshll.u32 %s350_s23, 3  ;;  %s1073_s22 = smov (!%p380_p13, %s376_s22), 0 }
  0x3b   : > { %s352_s6 = scalar_lea.vmem %s1043_s2, %s654_s0  ;;  %s382_s8 = sadd.s32 %s1073_s22, %s344_s18 }
  0x3c   : > { %s660_s11 = sshll.u32 %s382_s8, 3 }
  0x3d   : > { %s384_s12 = scalar_lea.vmem %s1044_s3, %s660_s11 }
  0x40 PF: > { %p664_p2 = scmp.le.s32.totalorder %s965_s17, 0 }
  0x41   : > { %v420_v1 = vld [vmem:[%s352_s6] sm:$0xff] (!%p664_p2)  ;;  %vm416_vm0 = vcmask (!%p664_p2), 7168   ;;  %v864_v2 = vmov (!%p664_p2), -1e+30   ;;  %v865_v3 = vmov (!%p664_p2), 0   ;;  %v866_v5 = vmov (!%p664_p2), 0.0  }
  0x42   : > { %411 = sbr.rel (%p664_p2) target bundleno = 735 (0x2df), region = 40  ;;  %422 = vmax.xlane.f32.xlu0 (!%p664_p2), %v420_v1  ;;  %417 = vst.msk [vmem:[#allocation2] sm:$0xff] (!%p664_p2), %vm416_vm0, %v864_v2  ;;  %748 = vset.pattern.permute.xlu1 (!%p664_p2), %v865_v3  ;;  %v448_v4 = vld [vmem:[%s384_s12] sm:$0xff] (!%p664_p2)  ;;  %418 = vst.msk [vmem:[#allocation3] sm:$0xff] (!%p664_p2), %vm416_vm0, %v866_v5  ;;  %v446_v13 = vlaneseq (!%p664_p2)  ;;  %s479_s27 = sld [smem:[#allocation6 + %s851_s26]] (!%p664_p2) }
  0x43   : > { %747 = vset.pattern.permute.xlu0 (!%p664_p2), %v865_v3  ;;  %453 = vperm.xlu1 (!%p664_p2), %748, %v448_v4   ;;  %419 = vst.msk [vmem:[#allocation4] sm:$0xff] (!%p664_p2), %vm416_vm0, %v866_v5 }
  0x44   : > { %v984_v14 = vand.u32 (!%p664_p2), 127, %v446_v13  ;;  %v476_v18 = vshrl.u32 (!%p664_p2), %v446_v13, 7 }
  0x46   : > { %vm505_vm3 = vcmp.eq.s32.totalorder (!%p664_p2), %v476_v18, 0  ;;  %vm506_vm4 = vcmp.eq.s32.totalorder (!%p664_p2), %v984_v14, 0  ;;  %vm510_vm5 = vcmp.eq.s32.totalorder (!%p664_p2), %v476_v18, 1 }
  0x47   : > { %vm507_vm6 = vmand (!%p664_p2), %vm505_vm3, %vm506_vm4 }
  0x48   : > { %v480_v19 = vstv (!%p664_p2), %s479_s27  ;;  %vm511_vm7 = vmand (!%p664_p2), %vm510_vm5, %vm506_vm4 }
  0x49   : > { %v421_v6 = vld [vmem:[#allocation2] sm:$0xff]  ;;  %vm481_vm2 = vcmp.lt.s32.totalorder %v476_v18, %v480_v19  ;;  %v433_v24 = vld [vmem:[#allocation3] sm:$0xff] }
  0x4a   : > { %v665_v20 = vsel %vm481_vm2, 1.0, %v866_v5  ;;  %v459_v32 = vld [vmem:[#allocation4] sm:$0xff] }
  0x4b   : > { %v495_v21 = vsel %vm416_vm0, %v665_v20, 0.0 }
  0xc2   : > { %v454_v16 = vpop.permute.xlu1 %453 }
  0xc3   : > { %vm455_vm1 = vcmp.eq.s32.totalorder %v984_v14, %v454_v16 }
  0xc4   : > { %v456_v17 = vsel %vm455_vm1, %v420_v1, 0.0 }
  0xcf   : > { %v423_v7 = vpop.xlane.xlu0 %422 }
  0xd0   : > { %v424_v8 = vmax.f32 %v421_v6, %v423_v7 }
  0xd2   : > { %v434_v9 = vsub.f32 %v421_v6, %v424_v8  ;;  %443 = vst.msk [vmem:[#allocation2] sm:$0xff] %vm416_vm0, %v424_v8  ;;  %427 = vperm.xlu0 %747, %v424_v8  }
  0xd4   : > { %v435_v22 = vmul.f32 1.442695, %v434_v9 }
  0xd9   : > { %v469_v38 = vld [vmem:[#allocation2] sm:$0xff] }
 0x151   : > { %v428_v10 = vpop.permute.xlu0 %427 }
 0x152   : > { %v430_v11 = vsub.f32 %v420_v1, %v428_v10 }
 0x154   : > { %v431_v12 = vmul.f32 1.442695, %v430_v11 }
 0x156   : > { %749 = vpow2.f32 %v431_v12 }
 0x157   : > { %751 = vpow2.f32 %v435_v22 }
 0x160   : > { %v750_v15 = vpop.eup %749 }
 0x161   : > { %438 = vadd.xlane.f32.xlu1 %v750_v15  ;;  %v752_v23 = vpop.eup %751 }
 0x162   : > { %v437_v25 = vmul.f32 %v752_v23, %v433_v24 }
 0x165   : > { %444 = vadd.xlane.f32.xlu1 %v420_v1 }
 0x169   : > { %457 = vadd.xlane.f32.xlu1 %v456_v17 }
 0x16d   : > { %496 = vadd.xlane.f32.xlu1 %v495_v21 }
 0x1ee   : > { %v439_v26 = vpop.xlane.xlu1 %438 }
 0x1ef   : > { %v440_v27 = vadd.f32 %v439_v26, %v437_v25 }
 0x1f1   : > { %442 = vst.msk [vmem:[#allocation3] sm:$0xff] %vm416_vm0, %v440_v27 }
 0x1f2   : > { %v445_v28 = vpop.xlane.xlu1 %444 }
 0x1f3   : > { %v460_v29 = vmul.f32 0.0007874016, %v445_v28 }
 0x1f6   : > { %v458_v30 = vpop.xlane.xlu1 %457 }
 0x1f7   : > { %v461_v31 = vmul.f32 0.8992126, %v458_v30 }
 0x1f8   : > { %v468_v33 = vld [vmem:[#allocation3] sm:$0xff] }
 0x1f9   : > { %v462_v34 = vadd.f32 %v461_v31, %v460_v29  ;;  %753 = vlog2.f32 %v468_v33 }
 0x1fa   : > { %v497_v44 = vpop.xlane.xlu1 %496 }
 0x1fb   : > { %v463_v35 = vadd.f32 %v462_v34, %v459_v32  ;;  %v498_v45 = vrot.slane %v497_v44, 4 }
 0x1fd   : > { %464 = vst.msk [vmem:[#allocation4] sm:$0xff] %vm416_vm0, %v463_v35  ;;  %v499_v46 = vadd.f32 %v498_v45, %v497_v44 }
 0x1ff   : > { %v500_v47 = vrot.slane %v499_v46, 2 }
 0x201   : > { %v501_v51 = vadd.f32 %v500_v47, %v499_v46 }
 0x203   : > { %v754_v36 = vpop.eup %753  ;;  %v502_v54 = vrot.slane %v501_v51, 1 }
 0x204   : > { %v471_v37 = vmul.f32 0.6931472, %v754_v36  ;;  %v473_v40 = vld [vmem:[#allocation4] sm:$0xff] }
 0x205   : > { %v503_v57 = vadd.f32 %v502_v54, %v501_v51 }
 0x206   : > { %v472_v39 = vadd.f32 %v471_v37, %v469_v38 }
 0x208   : > { %v474_v41 = vsub.f32 %v472_v39, %v473_v40 }
 0x20a   : > { %v484_v42 = vmul.f32 %v665_v20, %v474_v41 }
 0x20c   : > { %v485_v43 = vsel %vm416_vm0, %v484_v42, 0.0 }
 0x20d   : > { %486 = vadd.xlane.f32.xlu0 %v485_v43 }
 0x29a   : > { %v487_v48 = vpop.xlane.xlu0 %486 }
 0x29b   : > { %v488_v49 = vrot.slane %v487_v48, 4 }
 0x29d   : > { %v489_v50 = vadd.f32 %v488_v49, %v487_v48 }
 0x29f   : > { %v490_v52 = vrot.slane %v489_v50, 2 }
 0x2a1   : > { %v491_v53 = vadd.f32 %v490_v52, %v489_v50 }
 0x2a3   : > { %v492_v55 = vrot.slane %v491_v53, 1 }
 0x2a5   : > { %v493_v56 = vadd.f32 %v492_v55, %v491_v53 }
 0x2a7   : > { %682 = vpush %v493_v56 }
 0x2a8   : > { %684 = vpush %v503_v57 }
 0x2d8   : > { %s683_s5 = spop %682 }
 0x2d9   : > { %v508_v58 = vstv %s683_s5  ;;  %s685_s11 = spop %684 }
 0x2da   : > { %v509_v59 = vsel %vm507_vm6, %v508_v58, 0.0  ;;  %v512_v60 = vstv %s685_s11 }
 0x2db   : > { %v513_v61 = vsel %vm511_vm7, %v512_v60, 0.0 }
 0x2dc   : > { %v514_v62 = vadd.f32 %v513_v61, %v509_v59 }
 0x2de   : > { %515 = vst [vmem:[%s975_s15] sm:$0xff] %v514_v62 }
 0x2df PF: > { %s667_s13 = sshll.u32 %s851_s26, 7  ;;  %s531_s18 = sshll.u32 %s975_s15, 4  ;;  %s532_s18 = int_to_ptr.vmem [resolvable:$true] %s531_s18 }
 0x2e0   : > { %s998_s17 = scalar_lea.hbm %s1045_s4, %s667_s13  ;;  %s1054_s19 = sand.u32 1, %s843_s24  }
 0x2e1   : > { %s517_s20 = scalar_lea.sflag [#allocation9], %s1054_s19  ;;  %s779_s21 = scalar_lea.vmem %s532_s18, 128 }
 0x2e2   : > { %p780_p3 = scmp.ne.s32.totalorder %s532_s18, %s779_s21  ;;  %s867_s22 = smov [#allocation8]  }
 0x2e3   : > { %s783_s23 = sshll.u32 %s867_s22, 4  ;;  %s784_s23 = int_to_ptr.vmem [resolvable:$false] %s783_s23 }
 0x2e4   : > { %p781_p5 = pnand %p780_p3, %p939_p0  ;;  %s785_s0 = scalar_lea.vmem %s784_s23, 256 }
 0x2e5   : > { %p786_p7 = scmp.lt.s32.totalorder %s532_s18, %s784_s23  ;;  %p787_p8 = scmp.lt.s32.totalorder %s785_s0, %s779_s21 }
 0x2e6   : > { %p782_p6 = pneg %p781_p5 }
 0x2e7   : > { %p788_p9 = por %p787_p8, %p786_p7 }
 0x2e9   : > { %p789_p10 = pnand %p788_p9, %p782_p6 }
 0x2eb   : > { %792 = shalt.err (!%p789_p10)
}
 0x2ec   : > { %s793_s26 = scalar_lea.hbm %s998_s17, 128  ;;  %s797_s6 = scalar_lea.hbm %s1045_s4, 256 }
 0x2ed   : > { %p794_p11 = scmp.ne.s32.totalorder %s998_s17, %s793_s26  ;;  %p798_p1 = scmp.lt.u32.totalorder %s998_s17, %s1045_s4 }
 0x2ee   : > { %p799_p2 = scmp.lt.u32.totalorder %s797_s6, %s793_s26  ;;  %p801_p5 = scmp.lt.u32.totalorder %s793_s26, %s998_s17 }
 0x2ef   : > { %p795_p12 = pnand %p794_p11, %p939_p0 }
 0x2f0   : > { %p800_p3 = por %p799_p2, %p798_p1 }
 0x2f1   : > { %p796_p13 = pneg %p795_p12 }
 0x2f2   : > { %p802_p6 = por %p801_p5, %p800_p3 }
 0x2f4   : > { %p803_p7 = pnand %p802_p6, %p796_p13 }
 0x2f6   : > { %806 = shalt.err (!%p803_p7)
}
 0x2f7   : > { %686 = dma.vmem_to_hbm [thread:$0]  (%p939_p0), %s532_s18, 128, %s998_s17, %s517_s20  }
 0x2f8 PF: > { %p692_p8 = scmp.ge.s32.totalorder %s859_s28, 2  ;;  %s543_s15 = sand.u32 1, %s839_s1  }
 0x2f9   : > { %s544_s27 = scalar_lea.sflag [#allocation9], %s543_s15 }
 0x2fa   : > { %p689_p9 = pnand %p692_p8, %p946_p4 }
 0x2fc   : > { %834 = dma.done.wait (!%p689_p9), %s544_s27, 128  }
 0x2fd   : > { %836 = vsyncadd (!%p689_p9), %s544_s27, 4294967168  ;;  %s27_s28 = sadd.s32 1, %s859_s28   ;;  %s1055_s26 = sld [smem:[#allocation12_spill]] }
 0x2fe   : > { %p24_p10 = scmp.ge.s32.totalorder %s27_s28, 4   ;;  %s1056_s27 = sld [smem:[#allocation13_spill]] }
 0x2ff   : > { %s1057_s1 = smov %s843_s24  ;;  %s1058_s24 = smov %s847_s25 }
 0x300   : > { %s1059_s25 = smov %s952_s10  ;;  %26 = sbr.rel (!%p24_p10) target bundleno = 29 (0x1d), region = 86 }
 0x307   :  { %549 = vsyncpa [#allocation9], 1 }
 0x308   :  { %551 = vsyncpa [#allocation9 + $0x1], 1 }

</bundles_post_ra>
